<compile_context>
chip_gen: v7x
topology: tpu7x:2x2x1
jax: 0.10.0
libtpu: 0.0.40
codegen_flags: <defaults>
</compile_context>

<pallas_src>
import functools
import math

import numpy as np

import jax
import jax.numpy as jnp
from jax import lax
from jax.experimental import pallas as pl
from jax.experimental.pallas import tpu as pltpu


_NEG_BIG = -1e30            # "minus infinity" for masked logits (exp underflows to 0)
_INT_MIN = -2147483648
_INT_MAX = 2147483647
_VAL_BITS = 32              # bisection steps over the int32 order-key space


# ---------------------------------------------------------------------------
# helpers used inside the kernels
# ---------------------------------------------------------------------------
def _order_key(x):
    """Monotone f32 -> int32 map: x < y  <=>  key(x) < key(y) (finite values)."""
    bits = pltpu.bitcast(x, jnp.int32)
    return jnp.where(bits < 0, bits ^ jnp.int32(0x7FFFFFFF), bits)


def _topk_select(masked, nn, col, idx_steps):
    """Exact membership mask of the top-`nn` entries per row of `masked`
    (ties broken by smallest column index), via bisection instead of an O(B)
    rank-count loop."""
    tm = masked.shape[0]
    key = _order_key(masked)                                     # (tm, B) int32

    # -- value bisection: thr = nn-th largest key per row (exact) ------------
    lo0 = jnp.full((tm, 1), _INT_MIN, jnp.int32)
    hi0 = jnp.full((tm, 1), _INT_MAX, jnp.int32)

    def vstep(_, carry):
        lo, hi = carry
        mid = (lo >> 1) + (hi >> 1) + (lo & hi & 1)              # overflow-free floor-mean
        cnt = jnp.sum((key >= mid).astype(jnp.int32), axis=1, keepdims=True)
        pred = cnt >= nn
        return jnp.where(pred, mid, lo), jnp.where(pred, hi, mid)

    lo, _ = lax.fori_loop(0, _VAL_BITS, vstep, (lo0, hi0), unroll=4)
    thr = lo                                                     # (tm, 1)

    # -- tie handling: keep the first (nn - #strictly-greater) tied columns --
    gt = key > thr                                               # (tm, B)
    eq = key == thr
    cnt_gt = jnp.sum(gt.astype(jnp.int32), axis=1, keepdims=True)
    m = nn - cnt_gt                                              # >= 1 ties to keep

    clo0 = jnp.full((tm, 1), -1, jnp.int32)
    chi0 = jnp.full((tm, 1), masked.shape[1] - 1, jnp.int32)

    def cstep(_, carry):
        clo, chi = carry
        mid = (clo + chi) >> 1
        cnt = jnp.sum((eq & (col <= mid)).astype(jnp.int32), axis=1, keepdims=True)
        pred = cnt >= m
        return jnp.where(pred, clo, mid), jnp.where(pred, mid, chi)

    _, chi = lax.fori_loop(0, idx_steps, cstep, (clo0, chi0), unroll=2)
    return gt | (eq & (col <= chi))


def _direction_loss(q, keys, nn, eye, col, *, margin, inv_lamda, idx_steps):
    """Sum over the tile's rows of CE([pos, top-nn negatives + margin] / lamda, 0)."""
    # Streamed similarity tile: (tm, D) x (B, D) -> (tm, B) on the MXU, f32 acc.
    s = lax.dot_general(q, keys, (((1,), (1,)), ((), ())),
                        preferred_element_type=jnp.float32)
    pos = jnp.sum(jnp.where(eye, s, 0.0), axis=1, keepdims=True)   # diag(d)  (tm, 1)
    masked = jnp.where(eye, 0.0, s)                                # ranking matrix
    sel = _topk_select(masked, nn, col, idx_steps)                 # (tm, B) bool

    pos_l = pos * inv_lamda
    neg_l = jnp.where(sel, (s + margin) * inv_lamda, _NEG_BIG)
    mx = jnp.maximum(pos_l, jnp.max(neg_l, axis=1, keepdims=True))
    den = jnp.exp(pos_l - mx) + jnp.sum(jnp.exp(neg_l - mx), axis=1, keepdims=True)
    rows = mx + jnp.log(den) - pos_l                               # (tm, 1)
    return jnp.sum(rows, axis=0, keepdims=True)                    # (1, 1)


# ---------------------------------------------------------------------------
# Kernel 1 ('acc' mode only): streamed align / uniform statistics
# ---------------------------------------------------------------------------
def _stats_kernel(txt_tile_ref, img_full_ref, dsum_ref, esum_ref, *, tm, bsz):
    i = pl.program_id(0)
    s = lax.dot_general(txt_tile_ref[...], img_full_ref[...],
                        (((1,), (1,)), ((), ())),
                        preferred_element_type=jnp.float32)        # (tm, B)
    row_g = lax.broadcasted_iota(jnp.int32, (tm, bsz), 0) + i * tm
    col = lax.broadcasted_iota(jnp.int32, (tm, bsz), 1)
    eye = row_g == col

    dsum = jnp.sum(jnp.sum(jnp.where(eye, s, 0.0), axis=1, keepdims=True),
                   axis=0, keepdims=True)                          # (1, 1)
    esum = jnp.sum(jnp.sum(jnp.exp(-jnp.where(eye, 0.0, s)), axis=1, keepdims=True),
                   axis=0, keepdims=True)                          # (1, 1)
    dsum_ref[...] = jnp.broadcast_to(dsum, dsum_ref.shape)
    esum_ref[...] = jnp.broadcast_to(esum, esum_ref.shape)


# ---------------------------------------------------------------------------
# Kernel 2: fused ADCTO cross-entropy for both directions (streamed matmul)
# ---------------------------------------------------------------------------
def _adcto_loss_kernel(nn_ref, txt_tile_ref, img_tile_ref, img_full_ref, txt_full_ref,
                       part_ref, *, tm, bsz, margin, inv_lamda, idx_steps):
    i = pl.program_id(0)
    row_g = lax.broadcasted_iota(jnp.int32, (tm, bsz), 0) + i * tm
    col = lax.broadcasted_iota(jnp.int32, (tm, bsz), 1)
    eye = row_g == col

    t2i = _direction_loss(txt_tile_ref[...], img_full_ref[...], nn_ref[0], eye, col,
                          margin=margin, inv_lamda=inv_lamda, idx_steps=idx_steps)
    i2t = _direction_loss(img_tile_ref[...], txt_full_ref[...], nn_ref[1], eye, col,
                          margin=margin, inv_lamda=inv_lamda, idx_steps=idx_steps)

    # Lane-dense (8, 128) per-tile partial sum; reduced in JAX.  Keeping one
    # distinct output block per grid step keeps the axis "parallel" (v7x 2xTC).
    part_ref[...] = jnp.broadcast_to(t2i + i2t, part_ref.shape)


# ---------------------------------------------------------------------------
# wrappers
# ---------------------------------------------------------------------------
def _row_tile(B):
    # Largest aligned row tile dividing B, capped at 128 so the handful of live
    # (tm, B) f32/int32 temporaries stay within v7x's 64 MiB VMEM.
    for tm in (128, 64, 32, 16, 8):
        if B % tm == 0:
            return tm
    return B  # tiny / odd B: single full-array block


def _compiler_params(B, D, tm, itemsize):
    kw = dict(dimension_semantics=("parallel",))
    est = (4 * B * D * itemsize          # resident key arrays (worst-case buffering)
           + 4 * tm * D * itemsize       # double-buffered query tiles
           + 24 * tm * B * 4             # live (tm, B) temporaries in the select path
           + (1 << 20))
    if est > 32 * 1024 * 1024:
        kw["vmem_limit_bytes"] = int(min(est, 64 * 1024 * 1024))
    return pltpu.CompilerParams(**kw)


def _adcto_stats(txt, img, tm):
    B, D = txt.shape
    nt = B // tm
    dsum, esum = pl.pallas_call(
        functools.partial(_stats_kernel, tm=tm, bsz=B),
        out_shape=(jax.ShapeDtypeStruct((nt, 8, 128), jnp.float32),
                   jax.ShapeDtypeStruct((nt, 8, 128), jnp.float32)),
        grid_spec=pltpu.PrefetchScalarGridSpec(
            num_scalar_prefetch=0,
            grid=(nt,),
            in_specs=[pl.BlockSpec((tm, D), lambda i: (i, 0)),     # txt query tile
                      pl.BlockSpec((B, D), lambda i: (0, 0))],     # img keys (resident)
            out_specs=(pl.BlockSpec((1, 8, 128), lambda i: (i, 0, 0)),
                       pl.BlockSpec((1, 8, 128), lambda i: (i, 0, 0)))),
        compiler_params=_compiler_params(B, D, tm, jnp.dtype(txt.dtype).itemsize),
    )(txt, img)
    align = jnp.sum(dsum[:, 0, 0]) / B
    uniform = jnp.sum(esum[:, 0, 0]) / (B * B)
    return align, uniform


def _adcto_loss(txt, img, nn_arr, tm, margin, lamda):
    B, D = txt.shape
    nt = B // tm
    idx_steps = max(int(math.ceil(math.log2(B))), 1) if B > 1 else 1
    kern = functools.partial(_adcto_loss_kernel, tm=tm, bsz=B,
                             margin=float(margin), inv_lamda=float(1.0 / lamda),
                             idx_steps=idx_steps)
    parts = pl.pallas_call(
        kern,
        out_shape=jax.ShapeDtypeStruct((nt, 8, 128), jnp.float32),
        grid_spec=pltpu.PrefetchScalarGridSpec(
            num_scalar_prefetch=1,                                 # nn_arr -> SMEM
            grid=(nt,),
            in_specs=[pl.BlockSpec((tm, D), lambda i, nn: (i, 0)),  # txt query tile
                      pl.BlockSpec((tm, D), lambda i, nn: (i, 0)),  # img query tile
                      pl.BlockSpec((B, D), lambda i, nn: (0, 0)),   # img keys (resident)
                      pl.BlockSpec((B, D), lambda i, nn: (0, 0))],  # txt keys (resident)
            out_specs=pl.BlockSpec((1, 8, 128), lambda i, nn: (i, 0, 0))),
        compiler_params=_compiler_params(B, D, tm, jnp.dtype(txt.dtype).itemsize),
    )(nn_arr, txt, img, img, txt)
    return jnp.sum(parts[:, 0, 0]) * (0.5 / B)


def contrastive_loss(img, txt, txt_lens=None, *, margin=0.0, lamda=0.01,
                     scale=2.0, const_num=None, acc_mode='acc', matmul_dtype=None):
    """Pallas TPU implementation of ContrastiveLoss.forward.

    Returns (loss_scalar, [t2i_num_negs, i2t_num_negs]).
    txt_lens is accepted for signature parity but (as in the reference) unused.
    matmul_dtype=jnp.bfloat16 enables the cheaper MXU path (off by default: can
    flip top-k membership on near ties vs the f32 reference).
    """
    B, D = img.shape
    assert txt.shape == (B, D)
    if matmul_dtype is not None:
        img = img.astype(matmul_dtype)
        txt = txt.astype(matmul_dtype)
    tm = _row_tile(B)

    if acc_mode == 'acc':
        align, uniform = _adcto_stats(txt, img, tm)
        tmp = align + uniform
        # int() truncation as in the reference; integer-valued `scale` handled
        # exactly (negative base ** non-integer float would NaN under lax.pow).
        tmp_pow = tmp ** int(scale) if float(scale).is_integer() else tmp ** scale
        nn = jnp.maximum((jnp.cos(tmp_pow) * B).astype(jnp.int32) + 1, 1)
        nn = jnp.minimum(nn, B - 1)
        nn_t2i = nn_i2t = nn
    elif acc_mode == 'constant':
        nn_t2i = nn_i2t = (int(const_num) if const_num else 1)
    elif acc_mode == 'random':
        # TODO(synk): like the torch reference this draws on the host, but here the
        # counts are baked in at trace time rather than re-sampled per call.
        nn_t2i = int(np.random.randint(1, B))
        nn_i2t = int(np.random.randint(1, B))
    else:
        raise ValueError(f"unknown acc_mode: {acc_mode}")

    nn_arr = jnp.stack([jnp.asarray(nn_t2i, jnp.int32),
                        jnp.asarray(nn_i2t, jnp.int32)])           # (2,) int32
    loss = _adcto_loss(txt, img, nn_arr, tm, margin, lamda)
    return loss, [nn_t2i, nn_i2t]


# ---------------------------------------------------------------------------
# Pure-JAX reference mirroring the PyTorch module
# ---------------------------------------------------------------------------
def _reference_forward(img, txt, *, margin, lamda, scale, const_num, acc_mode):
    hi = jax.lax.Precision.HIGHEST

    def _align(d):
        return float(jnp.mean(jnp.diagonal(d)))

    def _uniform(d):
        Bn = d.shape[0]
        d0 = d - jnp.eye(Bn, dtype=d.dtype) * d
        return float(jnp.mean(jnp.exp(-d0)))

    def _adcto(d, query, keys):
        Bn = d.shape[0]
        pos = jnp.diagonal(d)[:, None]
        if acc_mode == 'acc':
            tmp = _align(d) + _uniform(d)
            nn = max(int(np.cos(tmp ** scale) * Bn) + 1, 1)
            nn = min(nn, Bn - 1)
        elif acc_mode == 'constant':
            nn = 1 if not const_num else const_num
        else:
            raise ValueError(acc_mode)
        eye = jnp.eye(Bn, dtype=bool)
        dm = jnp.where(eye, 0.0, d)
        order = jnp.argsort(-dm, axis=-1)[:, :nn]                  # (B, nn)
        neg_keys = keys[order]                                     # (B, nn, E)
        neg_logits = jnp.einsum('be,bne->bn', query, neg_keys, precision=hi) + margin
        logits = jnp.concatenate([pos, neg_logits], axis=1) / lamda
        lse = jax.scipy.special.logsumexp(logits, axis=1)
        return jnp.mean(lse - logits[:, 0]), nn

    d_full = jnp.matmul(txt, img.T, precision=hi)
    t2i, n1 = _adcto(d_full, txt, img)
    i2t, n2 = _adcto(d_full.T, img, txt)
    return (t2i + i2t) / 2.0, [n1, n2]


if __name__ == "__main__":
    key = jax.random.PRNGKey(0)
    k_img, k_txt = jax.random.split(key)

    B, D = 8, 32
    img = jax.random.normal(k_img, (B, D), dtype=jnp.float32)
    txt = jax.random.normal(k_txt, (B, D), dtype=jnp.float32)
    # cosine-similarity style unit-norm embeddings (keeps logits/lamda well scaled)
    img = img / jnp.linalg.norm(img, axis=-1, keepdims=True)
    txt = txt / jnp.linalg.norm(txt, axis=-1, keepdims=True)
    txt_lens = jnp.full((B,), D, dtype=jnp.int32)   # unused, parity with the PyTorch forward

    margin, lamda, scale, const_num = 0.2, 0.01, 2.0, 2

    # --- acc_mode='acc' (adaptive number of negatives) ---
    loss, negs = contrastive_loss(img, txt, txt_lens, margin=margin, lamda=lamda,
                                  scale=scale, const_num=const_num, acc_mode='acc')
    loss = jax.block_until_ready(loss)
    ref_loss, ref_negs = _reference_forward(img, txt, margin=margin, lamda=lamda,
                                            scale=scale, const_num=const_num,
                                            acc_mode='acc')
    assert jnp.allclose(loss, ref_loss, rtol=1e-3, atol=1e-2), (loss, ref_loss)
    assert int(negs[0]) == int(ref_negs[0]), (negs, ref_negs)
    assert int(negs[1]) == int(ref_negs[1]), (negs, ref_negs)

    # --- acc_mode='constant' ---
    loss_c, negs_c = contrastive_loss(img, txt, txt_lens, margin=margin, lamda=lamda,
                                      scale=scale, const_num=const_num,
                                      acc_mode='constant')
    loss_c = jax.block_until_ready(loss_c)
    ref_loss_c, ref_negs_c = _reference_forward(img, txt, margin=margin, lamda=lamda,
                                                scale=scale, const_num=const_num,
                                                acc_mode='constant')
    assert jnp.allclose(loss_c, ref_loss_c, rtol=1e-3, atol=1e-2), (loss_c, ref_loss_c)
    assert [int(x) for x in negs_c] == list(ref_negs_c), (negs_c, ref_negs_c)

    print("KERNEL_OK")
</pallas_src>

<mosaic_0001>
module attributes {stable_mosaic.version = 11 : i64} {
  func.func @_stats_kernel(%arg0: i32, %arg1: memref<8x32xf32, #tpu.memory_space<vmem>>, %arg2: memref<8x32xf32, #tpu.memory_space<vmem>>, %arg3: memref<1x8x128xf32, #tpu.memory_space<vmem>>, %arg4: memref<1x8x128xf32, #tpu.memory_space<vmem>>) attributes {dimension_semantics = [#tpu.dimension_semantics<parallel>], iteration_bounds = array<i64: 1>, scalar_prefetch = 0 : i64, scratch_operands = 0 : i64, tpu.core_type = #tpu.core_type<tc>, window_params = [{transform_indices = @transform_0, window_bounds = array<i64: 8, 32>}, {pipeline_mode = #tpu.pipeline_mode<synchronous>, transform_indices = @transform_1, window_bounds = array<i64: 8, 32>}, {transform_indices = @transform_2, window_bounds = array<i64: 1, 8, 128>}, {transform_indices = @transform_3, window_bounds = array<i64: 1, 8, 128>}]} {
    %c0 = arith.constant 0 : index
    %c0_0 = arith.constant 0 : index
    %0 = vector.load %arg1[%c0, %c0_0] : memref<8x32xf32, #tpu.memory_space<vmem>>, vector<8x32xf32>
    %c0_1 = arith.constant 0 : index
    %c0_2 = arith.constant 0 : index
    %1 = vector.load %arg2[%c0_1, %c0_2] : memref<8x32xf32, #tpu.memory_space<vmem>>, vector<8x32xf32>
    %cst = arith.constant dense<0.000000e+00> : vector<8x8xf32>
    %2 = tpu.matmul %0, %1, %cst {dimension_numbers = #tpu.dot_dimension_numbers<[1], [1], [0], [0], [0, 0, 1, 0], [], []>} : vector<8x32xf32>, vector<8x32xf32>, vector<8x8xf32> -> vector<8x8xf32>
    %3 = tpu.iota {dimensions = array<i32: 0>} : vector<8x8xi32>
    %c8_i32 = arith.constant 8 : i32
    %4 = arith.muli %arg0, %c8_i32 : i32
    %5 = vector.broadcast %4 : i32 to vector<8x8xi32>
    %6 = arith.addi %3, %5 : vector<8x8xi32>
    %7 = tpu.iota {dimensions = array<i32: 1>} : vector<8x8xi32>
    %8 = arith.cmpi eq, %6, %7 : vector<8x8xi32>
    %cst_3 = arith.constant 0.000000e+00 : f32
    %9 = vector.broadcast %cst_3 : f32 to vector<8x8xf32>
    %10 = arith.select %8, %2, %9 : vector<8x8xi1>, vector<8x8xf32>
    %cst_4 = arith.constant dense<0.000000e+00> : vector<8xf32>
    %11 = vector.multi_reduction <add>, %10, %cst_4 [1] : vector<8x8xf32> to vector<8xf32>
    %12 = vector.shape_cast %11 : vector<8xf32> to vector<8x1xf32>
    %cst_5 = arith.constant dense<0.000000e+00> : vector<1xf32>
    %13 = vector.multi_reduction <add>, %12, %cst_5 [0] : vector<8x1xf32> to vector<1xf32>
    %14 = vector.shape_cast %13 : vector<1xf32> to vector<1x1xf32>
    %cst_6 = arith.constant 0.000000e+00 : f32
    %15 = vector.broadcast %cst_6 : f32 to vector<8x8xf32>
    %16 = arith.select %8, %15, %2 : vector<8x8xi1>, vector<8x8xf32>
    %cst_7 = arith.constant 0.000000e+00 : f32
    %17 = vector.broadcast %cst_7 : f32 to vector<8x8xf32>
    %18 = arith.subf %17, %16 : vector<8x8xf32>
    %19 = math.exp %18 : vector<8x8xf32>
    %cst_8 = arith.constant dense<0.000000e+00> : vector<8xf32>
    %20 = vector.multi_reduction <add>, %19, %cst_8 [1] : vector<8x8xf32> to vector<8xf32>
    %21 = vector.shape_cast %20 : vector<8xf32> to vector<8x1xf32>
    %cst_9 = arith.constant dense<0.000000e+00> : vector<1xf32>
    %22 = vector.multi_reduction <add>, %21, %cst_9 [0] : vector<8x1xf32> to vector<1xf32>
    %23 = vector.shape_cast %22 : vector<1xf32> to vector<1x1xf32>
    %24 = vector.shape_cast %14 : vector<1x1xf32> to vector<1x1x1xf32>
    %25 = vector.broadcast %24 : vector<1x1x1xf32> to vector<1x8x128xf32>
    %c0_10 = arith.constant 0 : index
    %c0_11 = arith.constant 0 : index
    %c0_12 = arith.constant 0 : index
    %26 = vector.load %arg3[%c0_10, %c0_11, %c0_12] : memref<1x8x128xf32, #tpu.memory_space<vmem>>, vector<1x8x128xf32>
    tpu.vector_store %arg3[%c0_10, %c0_11, %c0_12], %25 {strides = array<i32>} : memref<1x8x128xf32, #tpu.memory_space<vmem>>, vector<1x8x128xf32>,
    %27 = vector.shape_cast %23 : vector<1x1xf32> to vector<1x1x1xf32>
    %28 = vector.broadcast %27 : vector<1x1x1xf32> to vector<1x8x128xf32>
    %c0_13 = arith.constant 0 : index
    %c0_14 = arith.constant 0 : index
    %c0_15 = arith.constant 0 : index
    %29 = vector.load %arg4[%c0_13, %c0_14, %c0_15] : memref<1x8x128xf32, #tpu.memory_space<vmem>>, vector<1x8x128xf32>
    tpu.vector_store %arg4[%c0_13, %c0_14, %c0_15], %28 {strides = array<i32>} : memref<1x8x128xf32, #tpu.memory_space<vmem>>, vector<1x8x128xf32>,
    return
  }
  func.func @transform_0(%arg0: i32) -> (i32, i32) {
    %c0_i32 = arith.constant 0 : i32
    %c0_i32_0 = arith.constant 0 : i32
    return %arg0, %c0_i32 : i32, i32
  }
  func.func @transform_1(%arg0: i32) -> (i32, i32) {
    %c0_i32 = arith.constant 0 : i32
    %c0_i32_0 = arith.constant 0 : i32
    %c0_i32_1 = arith.constant 0 : i32
    return %c0_i32, %c0_i32_0 : i32, i32
  }
  func.func @transform_2(%arg0: i32) -> (i32, i32, i32) {
    %c0_i32 = arith.constant 0 : i32
    %c0_i32_0 = arith.constant 0 : i32
    %c0_i32_1 = arith.constant 0 : i32
    return %arg0, %c0_i32, %c0_i32_0 : i32, i32, i32
  }
  func.func @transform_3(%arg0: i32) -> (i32, i32, i32) {
    %c0_i32 = arith.constant 0 : i32
    %c0_i32_0 = arith.constant 0 : i32
    %c0_i32_1 = arith.constant 0 : i32
    return %arg0, %c0_i32, %c0_i32_0 : i32, i32, i32
  }
}

</mosaic_0001>

<bundles_post_ra>
// kernel: tpu_custom_call.1
= control target key start
LH: loop header
LB: loop body
LE: loop exit
PB: predicated region body
PF: predicated region fallthrough
CT: control target
= control target key end

     0   :  { %9 = vsyncpa [#allocation3], 0  ;;  %s369_s0 = inlined_call_operand.hbm [shape: f32[8,32], index: 0, kind: input, shape index: {}]   ;;  %s370_s1 = inlined_call_operand.hbm [shape: f32[8,32], index: 1, kind: input, shape index: {}]   ;;  %s371_s2 = inlined_call_operand.hbm [shape: f32[1,8,128], index: 2, kind: output, shape index: {0}]   ;;  %s372_s3 = inlined_call_operand.hbm [shape: f32[1,8,128], index: 3, kind: output, shape index: {1}]  }
   0x1   :  { %10 = vsyncpa [#allocation6], 0 }
   0x2   :  { %11 = vsyncpa [#allocation4], 0 }
   0x3   :  { %12 = vsyncpa [#allocation9], 0  ;;  %s295_s12 = smov [#allocation2]   ;;  %s296_s14 = smov [#allocation5]  }
   0x4   :  { %s19_s13 = sshll.u32 %s295_s12, 4  ;;  %s29_s15 = sshll.u32 %s296_s14, 4  ;;  %s20_s13 = int_to_ptr.vmem [resolvable:$true] %s19_s13  ;;  %s30_s15 = int_to_ptr.vmem [resolvable:$true] %s29_s15 }
   0x5   :  { %s199_s18 = scalar_lea.hbm %s369_s0, 128 }
   0x6   :  { %p200_p0 = scmp.ne.s32.totalorder %s369_s0, %s199_s18  ;;  %p203_p1 = scmp.lt.u32.totalorder %s199_s18, %s369_s0 }
   0x8   :  { %p205_p2 = pnand %p203_p1, %p200_p0 }
   0xa   :  { %208 = shalt.err (!%p205_p2)
}
   0xb   :  { %s209_s23 = scalar_lea.vmem %s20_s13, 128  ;;  %p214_p4 = scmp.lt.s32.totalorder %s20_s13, %s20_s13 }
   0xc   :  { %p210_p3 = scmp.ne.s32.totalorder %s20_s13, %s209_s23  ;;  %p215_p5 = scmp.lt.s32.totalorder %s209_s23, %s209_s23 }
   0xe   :  { %p216_p6 = por %p215_p5, %p214_p4 }
  0x10   :  { %p217_p7 = pnand %p216_p6, %p210_p3 }
  0x12   :  { %220 = shalt.err (!%p217_p7)
}
  0x13   :  { %22 = dma.hbm_to_vmem [thread:$0]  %s369_s0, 128, %s20_s13, [#allocation3]  }
  0x14   :  { %s221_s28 = scalar_lea.hbm %s370_s1, 128 }
  0x15   :  { %p222_p8 = scmp.ne.s32.totalorder %s370_s1, %s221_s28  ;;  %p225_p9 = scmp.lt.u32.totalorder %s221_s28, %s370_s1 }
  0x17   :  { %p227_p10 = pnand %p225_p9, %p222_p8 }
  0x19   :  { %230 = shalt.err (!%p227_p10)
}
  0x1a   :  { %s231_s6 = scalar_lea.vmem %s30_s15, 128  ;;  %p236_p12 = scmp.lt.s32.totalorder %s30_s15, %s30_s15 }
  0x1b   :  { %p232_p11 = scmp.ne.s32.totalorder %s30_s15, %s231_s6  ;;  %p237_p13 = scmp.lt.s32.totalorder %s231_s6, %s231_s6 }
  0x1d   :  { %p238_p0 = por %p237_p13, %p236_p12 }
  0x1f   :  { %p239_p1 = pnand %p238_p0, %p232_p11 }
  0x21   :  { %242 = shalt.err (!%p239_p1)
}
  0x22   :  { %32 = dma.hbm_to_vmem [thread:$0]  %s370_s1, 128, %s30_s15, [#allocation6]  }
  0x23   :  { %287 = dma.done.wait [#allocation3], 128  }
  0x24   :  { %288 = vsyncadd [#allocation3], 4294967168 }
  0x25   :  { %289 = dma.done.wait [#allocation6], 128  }
  0x26   :  { %290 = vsyncadd [#allocation6], 4294967168  ;;  %v297_v0 = vmov 0.0   ;;  %vm298_vm0 = vmmov 0   ;;  %vm41_vm1 = vcmask 261120   ;;  %v40_v1 = vld [vmem:[#allocation5] sm:$0xff]  ;;  %v118_v3 = vlaneseq }
  0x27   :  { %186 = vmatprep.subr.mxu0 %v297_v0  ;;  %188 = vmatprep.mubr.msk.f32.mxu0 %vm298_vm0, %v297_v0  ;;  %v39_v2 = vld [vmem:[#allocation2] sm:$0xff]  ;;  %vm127_vm3 = vcmask 64512   ;;  %s299_s1 = smov [#allocation7]  }
  0x28   :  { %187 = vmatpush3.xpose.msk.msra.mxu0 %vm41_vm1, %v40_v1  ;;  %v119_v4 = vshrl.u32 %v118_v3, 7  ;;  %v124_v5 = vand.u32 127, %v118_v3  ;;  %s158_s8 = sshll.u32 %s299_s1, 4  ;;  %s159_s8 = int_to_ptr.vmem [resolvable:$true] %s158_s8 }
  0x29   :  { %s243_s9 = scalar_lea.vmem %s159_s8, 128  ;;  %p248_p3 = scmp.lt.s32.totalorder %s159_s8, %s159_s8 }
  0x2a   :  { %vm125_vm2 = vcmp.eq.s32.totalorder %v119_v4, %v124_v5  ;;  %p244_p2 = scmp.ne.s32.totalorder %s159_s8, %s243_s9  ;;  %p249_p4 = scmp.lt.s32.totalorder %s243_s9, %s243_s9 }
  0x2b   :  { %189 = vmatmul.mubr.msk.f32.vlgmr.msra.gmra.mrb[0].mxu0 %vm41_vm1, %v39_v2 }
  0x2c   :  { %p250_p5 = por %p249_p4, %p248_p3 }
  0x2e   :  { %p251_p6 = pnand %p250_p5, %p244_p2 }
  0xfe   :  { %v114_v6 = vpop.f32.mrb[0].mxu0 }
  0xff   :  { %v137_v7 = vsel %vm125_vm2, 0.0, %v114_v6  ;;  %v190_v8 = vpop.f32.mrb[1].mxu0  ;;  %v126_v9 = vsel %vm125_vm2, %v114_v6, 0.0 }
 0x100   :  { %v138_v10 = vsub.f32 0.0, %v137_v7  ;;  %v128_v11 = vsel %vm127_vm3, %v126_v9, 0.0 }
 0x101   :  { %129 = vadd.xlane.f32.xlu0 %v128_v11 }
 0x102   :  { %v139_v12 = vmul.f32 1.442695, %v138_v10 }
 0x104   :  { %197 = vpow2.f32 %v139_v12 }
 0x10e   :  { %v198_v13 = vpop.eup %197 }
 0x10f   :  { %v141_v14 = vsel %vm127_vm3, %v198_v13, 0.0 }
 0x110   :  { %142 = vadd.xlane.f32.xlu0 %v141_v14 }
 0x18e   :  { %v130_v15 = vpop.xlane.xlu0 %129 }
 0x18f   :  { %v131_v16 = vrot.slane %v130_v15, 4 }
 0x191   :  { %v132_v17 = vadd.f32 %v131_v16, %v130_v15 }
 0x193   :  { %v133_v18 = vrot.slane %v132_v17, 2 }
 0x195   :  { %v134_v19 = vadd.f32 %v133_v18, %v132_v17 }
 0x197   :  { %v135_v20 = vrot.slane %v134_v19, 1 }
 0x199   :  { %v136_v21 = vadd.f32 %v135_v20, %v134_v19 }
 0x19b   :  { %150 = vst [vmem:[#allocation7] sm:$0xff] %v136_v21 }
 0x19c   :  { %254 = shalt.err (!%p251_p6)
}
 0x19d   :  { %s255_s12 = scalar_lea.hbm %s371_s2, 128 }
 0x19e   :  { %p256_p7 = scmp.ne.s32.totalorder %s371_s2, %s255_s12  ;;  %p259_p8 = scmp.lt.u32.totalorder %s255_s12, %s371_s2 }
 0x1a0   :  { %p261_p9 = pnand %p259_p8, %p256_p7 }
 0x1a2   :  { %264 = shalt.err (!%p261_p9)
}
 0x1a3   :  { %161 = dma.vmem_to_hbm [thread:$0]  %s159_s8, 128, %s371_s2, [#allocation4]   ;;  %v143_v22 = vpop.xlane.xlu0 %142 }
 0x1a4   :  { %v144_v23 = vrot.slane %v143_v22, 4  ;;  %s300_s19 = smov [#allocation8]  }
 0x1a5   :  { %s168_s20 = sshll.u32 %s300_s19, 4  ;;  %s169_s20 = int_to_ptr.vmem [resolvable:$true] %s168_s20 }
 0x1a6   :  { %v145_v24 = vadd.f32 %v144_v23, %v143_v22  ;;  %s265_s21 = scalar_lea.vmem %s169_s20, 128  ;;  %p270_p11 = scmp.lt.s32.totalorder %s169_s20, %s169_s20 }
 0x1a7   :  { %p266_p10 = scmp.ne.s32.totalorder %s169_s20, %s265_s21  ;;  %p271_p12 = scmp.lt.s32.totalorder %s265_s21, %s265_s21 }
 0x1a8   :  { %v146_v25 = vrot.slane %v145_v24, 2 }
 0x1a9   :  { %p272_p13 = por %p271_p12, %p270_p11 }
 0x1aa   :  { %v147_v26 = vadd.f32 %v146_v25, %v145_v24 }
 0x1ab   :  { %p273_p0 = pnand %p272_p13, %p266_p10 }
 0x1ac   :  { %v148_v27 = vrot.slane %v147_v26, 1 }
 0x1ae   :  { %v149_v28 = vadd.f32 %v148_v27, %v147_v26 }
 0x1b0   :  { %151 = vst [vmem:[#allocation8] sm:$0xff] %v149_v28 }
 0x1b1   :  { %276 = shalt.err (!%p273_p0)
}
 0x1b2   :  { %s277_s23 = scalar_lea.hbm %s372_s3, 128 }
 0x1b3   :  { %p278_p1 = scmp.ne.s32.totalorder %s372_s3, %s277_s23  ;;  %p281_p2 = scmp.lt.u32.totalorder %s277_s23, %s372_s3 }
 0x1b5   :  { %p283_p3 = pnand %p281_p2, %p278_p1 }
 0x1b7   :  { %286 = shalt.err (!%p283_p3)
}
 0x1b8   :  { %171 = dma.vmem_to_hbm [thread:$0]  %s169_s20, 128, %s372_s3, [#allocation9]  }
 0x1b9   :  { %291 = dma.done.wait [#allocation4], 128  }
 0x1ba   :  { %292 = vsyncadd [#allocation4], 4294967168 }
 0x1bb   :  { %293 = dma.done.wait [#allocation9], 128  }
 0x1bc   :  { %294 = vsyncadd [#allocation9], 4294967168 }
 0x1bd   :  { %178 = vsyncpa [#allocation3], 1 }
 0x1be   :  { %179 = vsyncpa [#allocation6], 1 }
 0x1bf   :  { %180 = vsyncpa [#allocation4], 1 }
 0x1c0   :  { %181 = vsyncpa [#allocation9], 1 }

</bundles_post_ra>
